<compile_context>
chip_gen: v5e
topology: v5e:2x2
jax: 0.10.0
libtpu: 0.0.40
codegen_flags: <defaults>
</compile_context>

<pallas_src>
import functools

import jax
import jax.numpy as jnp
from jax.experimental import pallas as pl
from jax.experimental.pallas import tpu as pltpu


def _static_int_pow(x, k):
    """x**k for a static non-negative python int k — pure VPU multiplies."""
    acc = None
    base = x
    while k:
        if k & 1:
            acc = base if acc is None else acc * base
        k >>= 1
        if k:
            base = base * base
    return jnp.ones_like(x) if acc is None else acc


def _focal_kernel(preds_ref, labels_ref, alpha_ref, out_ref, *, gamma, n_rows):
    """One grid step processes a (C, TN) column-stripe of TN rows.

    preds_ref  : (C, TN) float  -- logits, classes on sublanes, rows on lanes
    labels_ref : (1, TN) int32  -- class index per row (lane-dense)
    alpha_ref  : (C, 1)  float32-- per-class alpha weights
    out_ref    : (1, TN) float32-- lane-dense loss accumulator (resident)
    """
    i = pl.program_id(0)
    tn = preds_ref.shape[1]

    @pl.when(i == 0)
    def _():
        out_ref[...] = jnp.zeros_like(out_ref)

    # Global row index of every lane; mask the ragged tail of the last block.
    col = i * tn + jax.lax.broadcasted_iota(jnp.int32, (1, tn), 1)
    valid = col < n_rows                                         # (1, TN)

    x = preds_ref[...].astype(jnp.float32)                       # (C, TN)
    x = jnp.where(valid, x, 0.0)   # neutralize garbage before transcendentals

    # numerically stable log-softmax over the class (sublane) axis
    m = jnp.max(x, axis=0, keepdims=True)                        # (1, TN)
    sh = x - m
    lse = jnp.log(jnp.sum(jnp.exp(sh), axis=0, keepdims=True))   # (1, TN)
    logsoft = sh - lse                                           # (C, TN)

    # gather(labels) emulated by a one-hot mask + sublane sum (C terms)
    labels = labels_ref[...]                                     # (1, TN)
    cls_ids = jax.lax.broadcasted_iota(jnp.int32, logsoft.shape, 0)
    onehot = (cls_ids == labels).astype(jnp.float32)             # (C, TN)

    logp = jnp.sum(onehot * logsoft, axis=0, keepdims=True)      # (1, TN)
    p = jnp.exp(logp)                                            # (1, TN)
    alpha_row = jnp.sum(onehot * alpha_ref[...], axis=0, keepdims=True)

    one_m_p = 1.0 - p
    if isinstance(gamma, int) and gamma >= 0:
        w = _static_int_pow(one_m_p, gamma)      # VPU multiply chain
    else:
        w = one_m_p ** gamma                     # generic (EUP exp/log) path

    loss = -alpha_row * w * logp                                 # (1, TN)
    out_ref[...] += jnp.where(valid, loss, 0.0)


def focal_loss_pallas(preds, labels, alpha_vec, *, gamma=2,
                      size_average=True, rows_per_step=131072):
    """Focal loss. preds: (..., C) logits, labels: (...) int class ids."""
    C = preds.shape[-1]
    preds2 = preds.reshape(-1, C)
    N = preds2.shape[0]

    # Lane-dense layout: rows on lanes (last axis), classes on sublanes.
    preds_t = preds2.T                                   # (C, N)
    labels_row = labels.reshape(1, -1).astype(jnp.int32) # (1, N)
    alpha_col = alpha_vec.reshape(C, 1).astype(jnp.float32)

    # Row tile: multiple of 128, capped so tiny inputs use a single block.
    tn = min(rows_per_step, ((N + 127) // 128) * 128)
    grid = (pl.cdiv(N, tn),)

    kernel = functools.partial(_focal_kernel, gamma=gamma, n_rows=N)

    out = pl.pallas_call(
        kernel,
        out_shape=jax.ShapeDtypeStruct((1, tn), jnp.float32),
        grid_spec=pltpu.PrefetchScalarGridSpec(
            num_scalar_prefetch=0,
            grid=grid,
            in_specs=[
                pl.BlockSpec((C, tn), lambda i: (0, i)),   # preds (C, N)
                pl.BlockSpec((1, tn), lambda i: (0, i)),   # labels (1, N)
                pl.BlockSpec((C, 1), lambda i: (0, 0)),    # alpha (C, 1)
            ],
            out_specs=pl.BlockSpec((1, tn), lambda i: (0, 0)),  # resident acc
        ),
        compiler_params=pltpu.CompilerParams(
            dimension_semantics=("arbitrary",)),
    )(preds_t, labels_row, alpha_col)

    total = jnp.sum(out)
    if size_average:
        total = total / jnp.float32(N)
    return total


def _reference_focal_loss(preds, labels, alpha_vec, gamma=2,
                          size_average=True):
    """Pure-JAX reference mirroring the PyTorch module."""
    C = preds.shape[-1]
    preds2 = preds.reshape(-1, C).astype(jnp.float32)
    labels1 = labels.reshape(-1).astype(jnp.int32)
    logsoft = jax.nn.log_softmax(preds2, axis=1)
    logp = jnp.take_along_axis(logsoft, labels1[:, None], axis=1)[:, 0]
    p = jnp.exp(logp)
    alpha = alpha_vec[labels1]
    loss = -alpha * ((1.0 - p) ** gamma) * logp
    return jnp.mean(loss) if size_average else jnp.sum(loss)


if __name__ == "__main__":
    # deterministic "parameter" init, mirroring focal_loss.__init__(alpha=0.25)
    alpha_scalar = 0.25
    num_classes = 4
    alpha_vec = jnp.concatenate([
        jnp.array([alpha_scalar], jnp.float32),
        jnp.full((num_classes - 1,), 1.0 - alpha_scalar, jnp.float32),
    ])

    key = jax.random.PRNGKey(0)
    kp, kl = jax.random.split(key)
    # preds: (batch=2, seq=16, num_classes=4) logits; labels: (2, 16) ints
    preds = jax.random.normal(kp, (2, 16, num_classes), jnp.float32)
    labels = jax.random.randint(kl, (2, 16), 0, num_classes, jnp.int32)

    loss = focal_loss_pallas(preds, labels, alpha_vec, gamma=2,
                             size_average=True)
    loss = jax.block_until_ready(loss)

    ref = _reference_focal_loss(preds, labels, alpha_vec, gamma=2,
                                size_average=True)
    assert jnp.allclose(loss, ref, rtol=1e-5, atol=1e-6), (loss, ref)

    print("KERNEL_OK")
</pallas_src>

<mosaic_0001>
module attributes {stable_mosaic.version = 11 : i64} {
  func.func @_focal_kernel(%arg0: i32, %arg1: memref<4x128xf32, #tpu.memory_space<vmem>>, %arg2: memref<1x128xi32, #tpu.memory_space<vmem>>, %arg3: memref<4x1xf32, #tpu.memory_space<vmem>>, %arg4: memref<1x128xf32, #tpu.memory_space<vmem>>) attributes {dimension_semantics = [#tpu.dimension_semantics<arbitrary>], iteration_bounds = array<i64: 1>, scalar_prefetch = 0 : i64, scratch_operands = 0 : i64, tpu.core_type = #tpu.core_type<tc>, window_params = [{transform_indices = @transform_0, window_bounds = array<i64: 4, 128>}, {transform_indices = @transform_1, window_bounds = array<i64: 1, 128>}, {pipeline_mode = #tpu.pipeline_mode<synchronous>, transform_indices = @transform_2, window_bounds = array<i64: 4, 1>}, {pipeline_mode = #tpu.pipeline_mode<synchronous>, transform_indices = @transform_3, window_bounds = array<i64: 1, 128>}]} {
    %c0_i32 = arith.constant 0 : i32
    %0 = arith.cmpi eq, %arg0, %c0_i32 : i32
    %1 = arith.extui %0 : i1 to i32
    %c0_i32_0 = arith.constant 0 : i32
    %2 = arith.cmpi ne, %1, %c0_i32_0 : i32
    scf.if %2 {
      %cst_17 = arith.constant 0.000000e+00 : f32
      %51 = vector.broadcast %cst_17 : f32 to vector<1x128xf32>
      %c0_18 = arith.constant 0 : index
      %c0_19 = arith.constant 0 : index
      %52 = vector.load %arg4[%c0_18, %c0_19] : memref<1x128xf32, #tpu.memory_space<vmem>>, vector<1x128xf32>
      tpu.vector_store %arg4[%c0_18, %c0_19], %51 {strides = array<i32>} : memref<1x128xf32, #tpu.memory_space<vmem>>, vector<1x128xf32>,
    } else {
    }
    %c128_i32 = arith.constant 128 : i32
    %3 = arith.muli %arg0, %c128_i32 : i32
    %4 = tpu.iota {dimensions = array<i32: 1>} : vector<1x128xi32>
    %5 = vector.broadcast %3 : i32 to vector<1x128xi32>
    %6 = arith.addi %5, %4 : vector<1x128xi32>
    %c32_i32 = arith.constant 32 : i32
    %7 = vector.broadcast %c32_i32 : i32 to vector<1x128xi32>
    %8 = arith.cmpi slt, %6, %7 : vector<1x128xi32>
    %c0 = arith.constant 0 : index
    %c0_1 = arith.constant 0 : index
    %9 = vector.load %arg1[%c0, %c0_1] : memref<4x128xf32, #tpu.memory_space<vmem>>, vector<4x128xf32>
    %cst = arith.constant 0.000000e+00 : f32
    %10 = vector.shape_cast %8 : vector<1x128xi1> to vector<1x128xi1>
    %11 = vector.broadcast %10 : vector<1x128xi1> to vector<4x128xi1>
    %12 = vector.broadcast %cst : f32 to vector<4x128xf32>
    %13 = arith.select %11, %9, %12 : vector<4x128xi1>, vector<4x128xf32>
    %cst_2 = arith.constant dense<0xFF800000> : vector<128xf32>
    %14 = vector.multi_reduction <maximumf>, %13, %cst_2 [0] : vector<4x128xf32> to vector<128xf32>
    %15 = vector.shape_cast %14 : vector<128xf32> to vector<1x128xf32>
    %16 = vector.broadcast %15 : vector<1x128xf32> to vector<4x128xf32>
    %17 = arith.subf %13, %16 : vector<4x128xf32>
    %18 = math.exp %17 : vector<4x128xf32>
    %cst_3 = arith.constant dense<0.000000e+00> : vector<128xf32>
    %19 = vector.multi_reduction <add>, %18, %cst_3 [0] : vector<4x128xf32> to vector<128xf32>
    %20 = vector.shape_cast %19 : vector<128xf32> to vector<1x128xf32>
    %21 = math.log %20 : vector<1x128xf32>
    %22 = vector.broadcast %21 : vector<1x128xf32> to vector<4x128xf32>
    %23 = arith.subf %17, %22 : vector<4x128xf32>
    %c0_4 = arith.constant 0 : index
    %c0_5 = arith.constant 0 : index
    %24 = vector.load %arg2[%c0_4, %c0_5] : memref<1x128xi32, #tpu.memory_space<vmem>>, vector<1x128xi32>
    %25 = tpu.iota {dimensions = array<i32: 0>} : vector<4x128xi32>
    %26 = vector.broadcast %24 : vector<1x128xi32> to vector<4x128xi32>
    %27 = arith.cmpi eq, %25, %26 : vector<4x128xi32>
    %28 = arith.extui %27 : vector<4x128xi1> to vector<4x128xi32>
    %29 = arith.sitofp %28 : vector<4x128xi32> to vector<4x128xf32>
    %30 = arith.mulf %29, %23 : vector<4x128xf32>
    %cst_6 = arith.constant dense<0.000000e+00> : vector<128xf32>
    %31 = vector.multi_reduction <add>, %30, %cst_6 [0] : vector<4x128xf32> to vector<128xf32>
    %32 = vector.shape_cast %31 : vector<128xf32> to vector<1x128xf32>
    %33 = math.exp %32 : vector<1x128xf32>
    %c0_7 = arith.constant 0 : index
    %c0_8 = arith.constant 0 : index
    %34 = vector.load %arg3[%c0_7, %c0_8] : memref<4x1xf32, #tpu.memory_space<vmem>>, vector<4x1xf32>
    %35 = vector.broadcast %34 : vector<4x1xf32> to vector<4x128xf32>
    %36 = arith.mulf %29, %35 : vector<4x128xf32>
    %cst_9 = arith.constant dense<0.000000e+00> : vector<128xf32>
    %37 = vector.multi_reduction <add>, %36, %cst_9 [0] : vector<4x128xf32> to vector<128xf32>
    %38 = vector.shape_cast %37 : vector<128xf32> to vector<1x128xf32>
    %cst_10 = arith.constant 1.000000e+00 : f32
    %39 = vector.broadcast %cst_10 : f32 to vector<1x128xf32>
    %40 = arith.subf %39, %33 : vector<1x128xf32>
    %41 = arith.mulf %40, %40 : vector<1x128xf32>
    %cst_11 = arith.constant 0.000000e+00 : f32
    %42 = vector.broadcast %cst_11 : f32 to vector<1x128xf32>
    %43 = arith.subf %42, %38 : vector<1x128xf32>
    %44 = arith.mulf %43, %41 : vector<1x128xf32>
    %45 = arith.mulf %44, %32 : vector<1x128xf32>
    %c0_12 = arith.constant 0 : index
    %c0_13 = arith.constant 0 : index
    %46 = vector.load %arg4[%c0_12, %c0_13] : memref<1x128xf32, #tpu.memory_space<vmem>>, vector<1x128xf32>
    %cst_14 = arith.constant 0.000000e+00 : f32
    %47 = vector.broadcast %cst_14 : f32 to vector<1x128xf32>
    %48 = arith.select %8, %45, %47 : vector<1x128xi1>, vector<1x128xf32>
    %49 = arith.addf %46, %48 : vector<1x128xf32>
    %c0_15 = arith.constant 0 : index
    %c0_16 = arith.constant 0 : index
    %50 = vector.load %arg4[%c0_15, %c0_16] : memref<1x128xf32, #tpu.memory_space<vmem>>, vector<1x128xf32>
    tpu.vector_store %arg4[%c0_15, %c0_16], %49 {strides = array<i32>} : memref<1x128xf32, #tpu.memory_space<vmem>>, vector<1x128xf32>,
    return
  }
  func.func @transform_0(%arg0: i32) -> (i32, i32) {
    %c0_i32 = arith.constant 0 : i32
    %c0_i32_0 = arith.constant 0 : i32
    return %c0_i32, %arg0 : i32, i32
  }
  func.func @transform_1(%arg0: i32) -> (i32, i32) {
    %c0_i32 = arith.constant 0 : i32
    %c0_i32_0 = arith.constant 0 : i32
    return %c0_i32, %arg0 : i32, i32
  }
  func.func @transform_2(%arg0: i32) -> (i32, i32) {
    %c0_i32 = arith.constant 0 : i32
    %c0_i32_0 = arith.constant 0 : i32
    %c0_i32_1 = arith.constant 0 : i32
    return %c0_i32, %c0_i32_0 : i32, i32
  }
  func.func @transform_3(%arg0: i32) -> (i32, i32) {
    %c0_i32 = arith.constant 0 : i32
    %c0_i32_0 = arith.constant 0 : i32
    %c0_i32_1 = arith.constant 0 : i32
    return %c0_i32, %c0_i32_0 : i32, i32
  }
}

</mosaic_0001>

<bundles_post_ra>
// kernel: tpu_custom_call.1
= control target key start
LH: loop header
LB: loop body
LE: loop exit
PB: predicated region body
PF: predicated region fallthrough
CT: control target
= control target key end

     0   :  { %v145_v1 = vmov 0   ;;  %s191_s0 = inlined_call_operand.vmem [shape: f32[4,32], index: 0, kind: input, shape index: {}]   ;;  %s192_s1 = inlined_call_operand.vmem [shape: s32[1,32], index: 1, kind: input, shape index: {}]   ;;  %s193_s2 = inlined_call_operand.vmem [shape: f32[4,1], index: 2, kind: input, shape index: {}]   ;;  %s194_s3 = inlined_call_operand.hbm [shape: f32[1,128], index: 3, kind: output, shape index: {}]  }
   0x1   :  { %v68_v0 = vld [vmem:[%s193_s2] sm:$0xf]  ;;  %111 = vset.pattern.permute.xlu0 %v145_v1 }
   0x2   :  { %8 = vsyncpa [#allocation3], 0  ;;  %71 = vperm.xlu0 %111, %v68_v0   ;;  %v21_v2 = vlaneseq  ;;  %v26_v4 = vld [vmem:[%s191_s0] sm:$0xf]  ;;  %vm30_vm1 = vcmask 1043456   ;;  %v146_v26 = vmov 0.0  }
   0x3   :  { %v112_v25 = vld [vmem:[%s192_s1] ss:$0 sm:$0xff]  ;;  %19 = vst [vmem:[#allocation2] sm:$0x1] %v146_v26  ;;  %s147_s1 = smov [#allocation2]   ;;  %s98_s19 = sshll.u32 %s194_s3, 4  ;;  %s99_s19 = int_to_ptr.hbm [resolvable:$true] %s98_s19 }
   0x4   :  { %v171_v3 = vand.u32 127, %v21_v2  ;;  %v53_v24 = vshrl.u32 %v21_v2, 7  ;;  %s96_s16 = sshll.u32 %s147_s1, 4  ;;  %s97_s16 = int_to_ptr.vmem [resolvable:$true] %s96_s16 }
   0x6   :  { %vm25_vm0 = vcmp.lt.s32.totalorder %v171_v3, 32  ;;  %vm55_vm2 = vcmp.eq.s32.totalorder %v53_v24, %v112_v25 }
   0x7   :  { %v29_v5 = vsel %vm25_vm0, %v26_v4, 0.0  ;;  %v107_v29 = vsel %vm55_vm2, 1.0, %v146_v26 }
   0x8   :  { %v31_v6 = vsel %vm30_vm1, %v29_v5, -inf }
   0x9   :  { %v32_v7 = vrot.slane %v31_v6, 4 }
   0xa   :  { %v87_v54 = vld [vmem:[#allocation2] sm:$0x1] }
   0xb   :  { %v33_v8 = vmax.f32 %v31_v6, %v32_v7 }
   0xd   :  { %v34_v9 = vrot.slane %v33_v8, 2 }
   0xf   :  { %v35_v10 = vmax.f32 %v33_v8, %v34_v9 }
  0x11   :  { %v36_v11 = vrot.slane %v35_v10, 1 }
  0x13   :  { %v37_v12 = vmax.f32 %v35_v10, %v36_v11 }
  0x15   :  { %v38_v13 = vsub.f32 %v29_v5, %v37_v12 }
  0x17   :  { %v39_v14 = vmul.f32 1.442695, %v38_v13 }
  0x19   :  { %113 = vpow2.f32 %v39_v14 }
  0x1f   :  { %v114_v15 = vpop.eup %113 }
  0x20   :  { %v41_v16 = vsel %vm30_vm1, %v114_v15, 0.0 }
  0x21   :  { %v42_v17 = vrot.slane %v41_v16, 4 }
  0x23   :  { %v43_v18 = vadd.f32 %v42_v17, %v41_v16 }
  0x25   :  { %v44_v19 = vrot.slane %v43_v18, 2 }
  0x27   :  { %v45_v20 = vadd.f32 %v44_v19, %v43_v18 }
  0x29   :  { %v46_v21 = vrot.slane %v45_v20, 1 }
  0x2b   :  { %v47_v22 = vadd.f32 %v46_v21, %v45_v20 }
  0x2d   :  { %115 = vlog2.f32 %v47_v22 }
  0x33   :  { %v116_v23 = vpop.eup %115 }
  0x34   :  { %v49_v27 = vmul.f32 0.6931472, %v116_v23 }
  0x36   :  { %v50_v28 = vsub.f32 %v38_v13, %v49_v27 }
  0x38   :  { %v58_v30 = vmul.f32 %v107_v29, %v50_v28 }
  0x3a   :  { %v59_v31 = vsel %vm30_vm1, %v58_v30, 0.0 }
  0x3b   :  { %v60_v32 = vrot.slane %v59_v31, 4 }
  0x3d   :  { %v61_v33 = vadd.f32 %v60_v32, %v59_v31 }
  0x3f   :  { %v62_v34 = vrot.slane %v61_v33, 2 }
  0x41   :  { %v63_v35 = vadd.f32 %v62_v34, %v61_v33 }
  0x43   :  { %v64_v36 = vrot.slane %v63_v35, 1 }
  0x45   :  { %v65_v37 = vadd.f32 %v64_v36, %v63_v35 }
  0x47   :  { %v66_v38 = vmul.f32 1.442695, %v65_v37 }
  0x49   :  { %117 = vpow2.f32 %v66_v38 }
  0x4f   :  { %v118_v44 = vpop.eup %117 }
  0x50   :  { %v82_v47 = vsub.f32 1.0, %v118_v44 }
  0x52   :  { %v83_v50 = vmul.f32 %v82_v47, %v82_v47 }
  0x74   :  { %v72_v39 = vpop.permute.xlu0 %71 }
  0x75   :  { %v74_v40 = vmul.f32 %v107_v29, %v72_v39 }
  0x77   :  { %v75_v41 = vsel %vm30_vm1, %v74_v40, 0.0 }
  0x78   :  { %v76_v42 = vrot.slane %v75_v41, 4 }
  0x7a   :  { %v77_v43 = vadd.f32 %v76_v42, %v75_v41 }
  0x7c   :  { %v78_v45 = vrot.slane %v77_v43, 2 }
  0x7e   :  { %v79_v46 = vadd.f32 %v78_v45, %v77_v43 }
  0x80   :  { %v80_v48 = vrot.slane %v79_v46, 1 }
  0x82   :  { %v81_v49 = vadd.f32 %v80_v48, %v79_v46 }
  0x84   :  { %v84_v51 = vsub.f32 0.0, %v81_v49 }
  0x86   :  { %v85_v52 = vmul.f32 %v84_v51, %v83_v50 }
  0x88   :  { %v86_v53 = vmul.f32 %v85_v52, %v65_v37 }
  0x8a   :  { %v88_v55 = vsel %vm25_vm0, %v86_v53, 0.0 }
  0x8b   :  { %v89_v56 = vadd.f32 %v88_v55, %v87_v54 }
  0x8d   :  { %90 = vst [vmem:[#allocation2] sm:$0x1] %v89_v56 }
  0x8e   :  { %101 = dma.vmem_to_hbm [thread:$0]  %s97_s16, 16, %s99_s19, [#allocation3]  }
  0x8f   :  { %143 = dma.done.wait [#allocation3], 16  }
  0x90   :  { %144 = vsyncadd [#allocation3], 4294967280 }
  0x91   :  { %106 = vsyncpa [#allocation3], 1 }

</bundles_post_ra>
